<compile_context>
chip_gen: v7x
topology: tpu7x:2x2x1
jax: 0.10.0
libtpu: 0.0.40
codegen_flags: <defaults>
</compile_context>

<pallas_src>
import jax
import jax.numpy as jnp
from jax import lax
from jax.experimental import pallas as pl
from jax.experimental.pallas import tpu as pltpu


# ---------------------------------------------------------------------------
# Kernels
# ---------------------------------------------------------------------------

def _encoder_kernel(x_ref, we_ref, be_ref, emb_ref, h_ref, acc_ref, ssq_ref):
    """h = relu( normalize(x) @ W_e.T + b_e + emb ).

    Grid = (B/tB, I/tI); the item axis (last, "arbitrary") is a reduction.
    We accumulate the un-normalized x @ W_e.T partials and the per-row
    sum-of-squares, then apply the L2 scale (diag-scale commutes with the
    matmul), bias, embedding and ReLU at the final reduction step.
    """
    k = pl.program_id(1)

    @pl.when(k == 0)
    def _init():
        acc_ref[...] = jnp.zeros_like(acc_ref)
        ssq_ref[...] = jnp.zeros_like(ssq_ref)

    x = x_ref[...]                                    # (tB, tI) bf16
    xf = x.astype(jnp.float32)
    ssq_ref[...] += jnp.sum(xf * xf, axis=-1, keepdims=True)

    # (tB, tI) . (H, tI) contracting over the item axis -> (tB, H), f32 acc.
    acc_ref[...] += lax.dot_general(
        x, we_ref[...],
        dimension_numbers=(((1,), (1,)), ((), ())),
        preferred_element_type=jnp.float32)

    # TODO(synk): training-mode dropout (corruption_ratio) not implemented;
    # forward follows eval-mode semantics (identity).

    @pl.when(k == pl.num_programs(1) - 1)
    def _finalize():
        # F.normalize: x / max(||x||, 1e-12)  ==  x * rsqrt(max(||x||^2, 1e-24))
        inv = lax.rsqrt(jnp.maximum(ssq_ref[...], 1e-24))
        h = acc_ref[...] * inv + be_ref[...] + emb_ref[...]
        h_ref[...] = jnp.maximum(h, 0.0).astype(h_ref.dtype)


def _decoder_kernel(h_ref, wd_ref, bd_ref, o_ref):
    """y = h @ W_d.T + b_d, tiled over (batch, item)."""
    out = lax.dot_general(
        h_ref[...], wd_ref[...],
        dimension_numbers=(((1,), (1,)), ((), ())),
        preferred_element_type=jnp.float32)
    o_ref[...] = (out + bd_ref[...]).astype(o_ref.dtype)


# ---------------------------------------------------------------------------
# Wrapper
# ---------------------------------------------------------------------------

_VMEM_LIMIT = 32 * 1024 * 1024  # fits v5e/v6e/v7x scoped VMEM


def _pick_batch_tile(b, preferred):
    if b <= preferred:
        return b
    assert b % 8 == 0, "batch must be a multiple of 8 when tiled"
    t = (preferred // 8) * 8
    while b % t:
        t -= 8
    return t


def _pick_item_tile(i, preferred):
    if i <= preferred:
        return i
    assert i % 128 == 0, "num_items must be a multiple of 128 when tiled"
    # TODO(synk): ragged num_items would need padding to a multiple of 128.
    t = (preferred // 128) * 128
    while i % t:
        t -= 128
    return t


def cdae_forward(x, user, params, *, tb=256, ti=1024):
    """x: (B, num_items) f32 (binary interactions), user: (B,) int32."""
    we = params["encoder_w"]            # (H, I)  nn.Linear(I, H) native layout
    be = params["encoder_b"][None, :]   # (1, H)
    wd = params["decoder_w"]            # (I, H)  nn.Linear(H, I) native layout
    bd = params["decoder_b"][None, :]   # (1, I)

    B, I = x.shape
    H = we.shape[0]

    # User-embedding gather is tiny (B*H) glue; keep it in plain JAX.
    emb = jnp.take(params["user_emb"], user, axis=0)            # (B, H) f32

    # bf16 MXU inputs (x is 0/1 -> exact in bf16), f32 accumulation in-kernel.
    xb = x.astype(jnp.bfloat16)
    web = we.astype(jnp.bfloat16)
    wdb = wd.astype(jnp.bfloat16)

    tB = _pick_batch_tile(B, tb)
    tI = _pick_item_tile(I, ti)
    nB, nI = B // tB, I // tI

    # ---- Encoder: (B, I) x (H, I) -> (B, H), reduction over the item axis.
    h = pl.pallas_call(
        _encoder_kernel,
        out_shape=jax.ShapeDtypeStruct((B, H), jnp.bfloat16),
        grid_spec=pltpu.PrefetchScalarGridSpec(
            num_scalar_prefetch=0,
            grid=(nB, nI),
            in_specs=[
                pl.BlockSpec((tB, tI), lambda i, k: (i, k)),    # x tile
                pl.BlockSpec((H, tI), lambda i, k: (0, k)),     # W_e tile
                pl.BlockSpec((1, H), lambda i, k: (0, 0)),      # b_e
                pl.BlockSpec((tB, H), lambda i, k: (i, 0)),     # user emb rows
            ],
            out_specs=pl.BlockSpec((tB, H), lambda i, k: (i, 0)),
            scratch_shapes=[
                pltpu.VMEM((tB, H), jnp.float32),               # matmul acc
                pltpu.VMEM((tB, 1), jnp.float32),               # sum-of-squares
            ],
        ),
        compiler_params=pltpu.CompilerParams(
            dimension_semantics=("parallel", "arbitrary"),
            vmem_limit_bytes=_VMEM_LIMIT),
        cost_estimate=pl.CostEstimate(
            flops=2 * B * I * H + 3 * B * I,
            transcendentals=B,
            bytes_accessed=B * I * 2 + I * H * 2 + B * H * 4 + H * 4 + B * H * 2),
    )(xb, web, be, emb)

    # ---- Decoder: (B, H) x (I, H) -> (B, I), lane-dense output tiles.
    out = pl.pallas_call(
        _decoder_kernel,
        out_shape=jax.ShapeDtypeStruct((B, I), jnp.float32),
        grid_spec=pltpu.PrefetchScalarGridSpec(
            num_scalar_prefetch=0,
            grid=(nB, nI),
            in_specs=[
                pl.BlockSpec((tB, H), lambda i, j: (i, 0)),     # h tile (reused over j)
                pl.BlockSpec((tI, H), lambda i, j: (j, 0)),     # W_d tile
                pl.BlockSpec((1, tI), lambda i, j: (0, j)),     # b_d tile
            ],
            out_specs=pl.BlockSpec((tB, tI), lambda i, j: (i, j)),
        ),
        compiler_params=pltpu.CompilerParams(
            dimension_semantics=("parallel", "parallel"),
            vmem_limit_bytes=_VMEM_LIMIT),
        cost_estimate=pl.CostEstimate(
            flops=2 * B * H * I,
            transcendentals=0,
            bytes_accessed=B * H * 2 + I * H * 2 + I * 4 + B * I * 4),
    )(h, wdb, bd)

    return out


# ---------------------------------------------------------------------------
# Params / references
# ---------------------------------------------------------------------------

def init_params(key, num_users, num_items, num_hidden):
    k1, k2, k3, k4, k5 = jax.random.split(key, 5)
    # Shapes match nn.Linear (out, in) / nn.Embedding.
    return {
        "encoder_w": jax.random.normal(k1, (num_hidden, num_items), jnp.float32) * 0.05,
        "encoder_b": jax.random.normal(k2, (num_hidden,), jnp.float32) * 0.05,
        "decoder_w": jax.random.normal(k3, (num_items, num_hidden), jnp.float32) * 0.05,
        "decoder_b": jax.random.normal(k4, (num_items,), jnp.float32) * 0.05,
        "user_emb": jax.random.normal(k5, (num_users, num_hidden), jnp.float32) * 0.05,
    }


def cdae_reference_bf16(x, user, params):
    """Pure-JAX reference mirroring the kernel's bf16-input / f32-acc numerics."""
    f32 = jnp.float32
    xb = x.astype(jnp.bfloat16).astype(f32)
    we = params["encoder_w"].astype(jnp.bfloat16).astype(f32)
    wd = params["decoder_w"].astype(jnp.bfloat16).astype(f32)
    ssq = jnp.sum(xb * xb, axis=-1, keepdims=True)
    inv = lax.rsqrt(jnp.maximum(ssq, 1e-24))
    enc = jnp.dot(xb, we.T, precision=lax.Precision.HIGHEST) * inv
    enc = enc + params["encoder_b"][None, :] + params["user_emb"][user]
    enc = jnp.maximum(enc, 0.0)
    encb = enc.astype(jnp.bfloat16).astype(f32)
    return jnp.dot(encb, wd.T, precision=lax.Precision.HIGHEST) + params["decoder_b"][None, :]


def cdae_reference_f32(x, user, params):
    """Plain f32 reference of the original PyTorch module semantics."""
    norm = jnp.sqrt(jnp.sum(x * x, axis=-1, keepdims=True))
    h = x / jnp.maximum(norm, 1e-12)
    enc = h @ params["encoder_w"].T + params["encoder_b"]
    enc = enc + params["user_emb"][user]
    enc = jnp.maximum(enc, 0.0)
    return enc @ params["decoder_w"].T + params["decoder_b"]


# ---------------------------------------------------------------------------
# Demo
# ---------------------------------------------------------------------------

if __name__ == "__main__":
    num_users, num_items, num_hidden = 16, 256, 128
    batch = 8

    key = jax.random.PRNGKey(0)
    kx, ku, kp = jax.random.split(key, 3)

    # Sparse-ish binary interaction matrix (exact in bf16).
    x = (jax.random.uniform(kx, (batch, num_items)) < 0.1).astype(jnp.float32)
    user = jax.random.randint(ku, (batch,), 0, num_users, dtype=jnp.int32)
    params = init_params(kp, num_users, num_items, num_hidden)

    # ti=128 exercises the multi-step reduction accumulator path at demo size.
    out = cdae_forward(x, user, params, tb=256, ti=128)
    out = jax.block_until_ready(out)
    assert out.shape == (batch, num_items)

    ref_bf16 = cdae_reference_bf16(x, user, params)
    assert jnp.allclose(out, ref_bf16, atol=2e-3, rtol=2e-3), "mismatch vs bf16 reference"

    ref_f32 = cdae_reference_f32(x, user, params)
    assert jnp.allclose(out, ref_f32, atol=2e-2, rtol=2e-2), "mismatch vs f32 module reference"

    print("KERNEL_OK")
</pallas_src>

<mosaic_0001>
module attributes {stable_mosaic.version = 11 : i64} {
  func.func @_encoder_kernel(%arg0: i32, %arg1: i32, %arg2: memref<8x128xbf16, #tpu.memory_space<vmem>>, %arg3: memref<128x128xbf16, #tpu.memory_space<vmem>>, %arg4: memref<1x128xf32, #tpu.memory_space<vmem>>, %arg5: memref<8x128xf32, #tpu.memory_space<vmem>>, %arg6: memref<8x128xbf16, #tpu.memory_space<vmem>>, %arg7: memref<8x128xf32, #tpu.memory_space<vmem>>, %arg8: memref<8x1xf32, #tpu.memory_space<vmem>>) attributes {dimension_semantics = [#tpu.dimension_semantics<parallel>, #tpu.dimension_semantics<arbitrary>], iteration_bounds = array<i64: 1, 2>, scalar_prefetch = 0 : i64, scratch_operands = 2 : i64, tpu.core_type = #tpu.core_type<tc>, window_params = [{transform_indices = @transform_0, window_bounds = array<i64: 8, 128>}, {transform_indices = @transform_1, window_bounds = array<i64: 128, 128>}, {pipeline_mode = #tpu.pipeline_mode<synchronous>, transform_indices = @transform_2, window_bounds = array<i64: 1, 128>}, {transform_indices = @transform_3, window_bounds = array<i64: 8, 128>}, {transform_indices = @transform_4, window_bounds = array<i64: 8, 128>}]} {
    %c0_i32 = arith.constant 0 : i32
    %0 = arith.cmpi eq, %arg1, %c0_i32 : i32
    %1 = arith.extui %0 : i1 to i32
    %c0_i32_0 = arith.constant 0 : i32
    %2 = arith.cmpi ne, %1, %c0_i32_0 : i32
    scf.if %2 {
      %cst_14 = arith.constant 0.000000e+00 : f32
      %19 = vector.broadcast %cst_14 : f32 to vector<8x128xf32>
      %c0_15 = arith.constant 0 : index
      %c0_16 = arith.constant 0 : index
      %20 = vector.load %arg7[%c0_15, %c0_16] : memref<8x128xf32, #tpu.memory_space<vmem>>, vector<8x128xf32>
      tpu.vector_store %arg7[%c0_15, %c0_16], %19 {strides = array<i32>} : memref<8x128xf32, #tpu.memory_space<vmem>>, vector<8x128xf32>,
      %cst_17 = arith.constant 0.000000e+00 : f32
      %21 = vector.broadcast %cst_17 : f32 to vector<8x1xf32>
      %c0_18 = arith.constant 0 : index
      %c0_19 = arith.constant 0 : index
      %22 = vector.load %arg8[%c0_18, %c0_19] : memref<8x1xf32, #tpu.memory_space<vmem>>, vector<8x1xf32>
      tpu.vector_store %arg8[%c0_18, %c0_19], %21 {strides = array<i32>} : memref<8x1xf32, #tpu.memory_space<vmem>>, vector<8x1xf32>,
    } else {
    }
    %c0 = arith.constant 0 : index
    %c0_1 = arith.constant 0 : index
    %3 = vector.load %arg2[%c0, %c0_1] : memref<8x128xbf16, #tpu.memory_space<vmem>>, vector<8x128xbf16>
    %4 = arith.extf %3 : vector<8x128xbf16> to vector<8x128xf32>
    %c0_2 = arith.constant 0 : index
    %c0_3 = arith.constant 0 : index
    %5 = vector.load %arg8[%c0_2, %c0_3] : memref<8x1xf32, #tpu.memory_space<vmem>>, vector<8x1xf32>
    %6 = arith.mulf %4, %4 : vector<8x128xf32>
    %cst = arith.constant dense<0.000000e+00> : vector<8xf32>
    %7 = vector.multi_reduction <add>, %6, %cst [1] : vector<8x128xf32> to vector<8xf32>
    %8 = vector.shape_cast %7 : vector<8xf32> to vector<8x1xf32>
    %9 = arith.addf %5, %8 : vector<8x1xf32>
    %c0_4 = arith.constant 0 : index
    %c0_5 = arith.constant 0 : index
    %10 = vector.load %arg8[%c0_4, %c0_5] : memref<8x1xf32, #tpu.memory_space<vmem>>, vector<8x1xf32>
    tpu.vector_store %arg8[%c0_4, %c0_5], %9 {strides = array<i32>} : memref<8x1xf32, #tpu.memory_space<vmem>>, vector<8x1xf32>,
    %c0_6 = arith.constant 0 : index
    %c0_7 = arith.constant 0 : index
    %11 = vector.load %arg7[%c0_6, %c0_7] : memref<8x128xf32, #tpu.memory_space<vmem>>, vector<8x128xf32>
    %c0_8 = arith.constant 0 : index
    %c0_9 = arith.constant 0 : index
    %12 = vector.load %arg3[%c0_8, %c0_9] : memref<128x128xbf16, #tpu.memory_space<vmem>>, vector<128x128xbf16>
    %cst_10 = arith.constant dense<0.000000e+00> : vector<8x128xf32>
    %13 = tpu.matmul %3, %12, %cst_10 {dimension_numbers = #tpu.dot_dimension_numbers<[1], [1], [0], [0], [0, 0, 1, 0], [], []>} : vector<8x128xbf16>, vector<128x128xbf16>, vector<8x128xf32> -> vector<8x128xf32>
    %14 = arith.addf %11, %13 : vector<8x128xf32>
    %c0_11 = arith.constant 0 : index
    %c0_12 = arith.constant 0 : index
    %15 = vector.load %arg7[%c0_11, %c0_12] : memref<8x128xf32, #tpu.memory_space<vmem>>, vector<8x128xf32>
    tpu.vector_store %arg7[%c0_11, %c0_12], %14 {strides = array<i32>} : memref<8x128xf32, #tpu.memory_space<vmem>>, vector<8x128xf32>,
    %c1_i32 = arith.constant 1 : i32
    %16 = arith.cmpi eq, %arg1, %c1_i32 : i32
    %17 = arith.extui %16 : i1 to i32
    %c0_i32_13 = arith.constant 0 : i32
    %18 = arith.cmpi ne, %17, %c0_i32_13 : i32
    scf.if %18 {
      %c0_14 = arith.constant 0 : index
      %c0_15 = arith.constant 0 : index
      %19 = vector.load %arg8[%c0_14, %c0_15] : memref<8x1xf32, #tpu.memory_space<vmem>>, vector<8x1xf32>
      %cst_16 = arith.constant 1.000000e-24 : f32
      %20 = vector.broadcast %cst_16 : f32 to vector<8x1xf32>
      %21 = arith.maximumf %19, %20 : vector<8x1xf32>
      %22 = math.rsqrt %21 : vector<8x1xf32>
      %c0_17 = arith.constant 0 : index
      %c0_18 = arith.constant 0 : index
      %23 = vector.load %arg7[%c0_17, %c0_18] : memref<8x128xf32, #tpu.memory_space<vmem>>, vector<8x128xf32>
      %24 = vector.broadcast %22 : vector<8x1xf32> to vector<8x128xf32>
      %25 = arith.mulf %23, %24 : vector<8x128xf32>
      %c0_19 = arith.constant 0 : index
      %c0_20 = arith.constant 0 : index
      %26 = vector.load %arg4[%c0_19, %c0_20] : memref<1x128xf32, #tpu.memory_space<vmem>>, vector<1x128xf32>
      %27 = vector.broadcast %26 : vector<1x128xf32> to vector<8x128xf32>
      %28 = arith.addf %25, %27 : vector<8x128xf32>
      %c0_21 = arith.constant 0 : index
      %c0_22 = arith.constant 0 : index
      %29 = vector.load %arg5[%c0_21, %c0_22] : memref<8x128xf32, #tpu.memory_space<vmem>>, vector<8x128xf32>
      %30 = arith.addf %28, %29 : vector<8x128xf32>
      %cst_23 = arith.constant 0.000000e+00 : f32
      %31 = vector.broadcast %cst_23 : f32 to vector<8x128xf32>
      %32 = arith.maximumf %30, %31 : vector<8x128xf32>
      %33 = arith.truncf %32 : vector<8x128xf32> to vector<8x128xbf16>
      %c0_24 = arith.constant 0 : index
      %c0_25 = arith.constant 0 : index
      %34 = vector.load %arg6[%c0_24, %c0_25] : memref<8x128xbf16, #tpu.memory_space<vmem>>, vector<8x128xbf16>
      tpu.vector_store %arg6[%c0_24, %c0_25], %33 {strides = array<i32>} : memref<8x128xbf16, #tpu.memory_space<vmem>>, vector<8x128xbf16>,
    } else {
    }
    return
  }
  func.func @transform_0(%arg0: i32, %arg1: i32) -> (i32, i32) {
    %c0_i32 = arith.constant 0 : i32
    return %arg0, %arg1 : i32, i32
  }
  func.func @transform_1(%arg0: i32, %arg1: i32) -> (i32, i32) {
    %c0_i32 = arith.constant 0 : i32
    %c0_i32_0 = arith.constant 0 : i32
    return %c0_i32, %arg1 : i32, i32
  }
  func.func @transform_2(%arg0: i32, %arg1: i32) -> (i32, i32) {
    %c0_i32 = arith.constant 0 : i32
    %c0_i32_0 = arith.constant 0 : i32
    %c0_i32_1 = arith.constant 0 : i32
    return %c0_i32, %c0_i32_0 : i32, i32
  }
  func.func @transform_3(%arg0: i32, %arg1: i32) -> (i32, i32) {
    %c0_i32 = arith.constant 0 : i32
    %c0_i32_0 = arith.constant 0 : i32
    return %arg0, %c0_i32 : i32, i32
  }
  func.func @transform_4(%arg0: i32, %arg1: i32) -> (i32, i32) {
    %c0_i32 = arith.constant 0 : i32
    %c0_i32_0 = arith.constant 0 : i32
    return %arg0, %c0_i32 : i32, i32
  }
}

</mosaic_0001>

<bundles_post_ra>
// kernel: tpu_custom_call.1
= control target key start
LH: loop header
LB: loop body
LE: loop exit
PB: predicated region body
PF: predicated region fallthrough
CT: control target
= control target key end

     0   :  { %9 = vsyncpa [#allocation5], 0  ;;  %s1078_s0 = inlined_call_operand.hbm [shape: bf16[8,256], index: 0, kind: input, shape index: {}]   ;;  %s1079_s1 = inlined_call_operand.hbm [shape: bf16[128,256], index: 1, kind: input, shape index: {}]   ;;  %s1080_s2 = inlined_call_operand.vmem [shape: f32[1,128], index: 2, kind: input, shape index: {}]   ;;  %s1081_s3 = inlined_call_operand.vmem [shape: f32[8,128], index: 3, kind: input, shape index: {}]   ;;  %s1082_s4 = inlined_call_operand.hbm [shape: bf16[8,128], index: 4, kind: output, shape index: {}]  }
   0x1   :  { %11 = vsyncpa [#allocation5 + $0x1], 0 }
   0x2   :  { %12 = vsyncpa [#allocation8], 0 }
   0x3   :  { %14 = vsyncpa [#allocation8 + $0x1], 0 }
   0x4   :  { %15 = vsyncpa [#allocation6], 0  ;;  %s860_s15 = smov 0   ;;  %s862_s16 = smov 0  }
   0x5   :  { %s864_s17 = smov 0   ;;  %s866_s18 = smov 0  }
   0x6   :  { %s868_s19 = smov 0   ;;  %s870_s20 = smov 0  }
   0x7 LB: > { %s539_s21 = sadd.s32 4294967295, %s823_s20   ;;  %s30_s22 = sadd.s32 1, %s819_s19  ;;  %s823_s20 = sphi %s870_s20, %s21_s20   ;;  %s819_s19 = sphi %s868_s19, %s1094_s19   ;;  %s815_s18 = sphi %s866_s18, %s1093_s18   ;;  %s811_s17 = sphi %s864_s17, %s1092_s17   ;;  %s807_s16 = sphi %s862_s16, %s1091_s16   ;;  %s803_s15 = sphi %s860_s15, %s1090_s15  }
   0x8   : > { %p31_p0 = scmp.ge.s32.totalorder %s30_s22, 2  ;;  %s42_s23 = sadd.s32 1, %s811_s17 }
   0x9   : > { %p49_p1 = scmp.ne.s32.totalorder %s811_s17, %s807_s16  ;;  %p50_p2 = scmp.eq.s32.totalorder %s823_s20, 0 }
   0xa   : > { %s1096_s22 = smov (%p31_p0, %s30_s22), 0  ;;  %p55_p4 = scmp.ne.s32.totalorder %s807_s16, %s803_s15 }
   0xb   : > { %p896_p3 = por %p50_p2, %p49_p1  ;;  %s38_s25 = ssub.s32 %s819_s19, %s1096_s22 }
   0xc   : > { %p56_p5 = scmp.eq.s32.totalorder %s539_s21, 0  ;;  %p40_p6 = scmp.eq.s32.totalorder %s38_s25, 0 }
   0xd   : > { %p609_p8 = scmp.lt.s32.totalorder %s823_s20, 2  ;;  %s914_s28 = sand.u32 1, %s811_s17  }
   0xe   : > { %p905_p7 = por %p56_p5, %p55_p4  ;;  %s544_s29 = sshll.u32 %s819_s19, 6 }
   0xf   : > { %s911_s27 = scalar_select %p40_p6, %s811_s17, %s42_s23  }
  0x10   : > { %s1085_s26 = scalar_select %p905_p7, 1, 0 }
  0x11   : > { %s543_s30 = sshll.u32 %s914_s28, 2  ;;  %s923_s7 = scalar_lea.hbm %s1078_s0, %s544_s29 }
  0x12   : > { %s192_s8 = scalar_lea.vmem [#allocation4], %s543_s30  ;;  %p927_p9 = pnand %p609_p8, %p896_p3 }
  0x13   : > { %s201_s9 = sshll.u32 %s192_s8, 4  ;;  %s545_s11 = sshll.u32 %s914_s28, 6  ;;  %s931_s9 = int_to_ptr.vmem [resolvable:$true] %s201_s9 }
  0x14   : > { %s189_s12 = scalar_lea.sflag [#allocation5], %s914_s28  ;;  %s679_s13 = scalar_lea.hbm %s923_s7, 64 }
  0x15   : > { %p680_p10 = scmp.ne.s32.totalorder %s923_s7, %s679_s13  ;;  %p681_p11 = pneg %p927_p9 }
  0x16   : > { %s684_s23 = scalar_lea.hbm %s1078_s0, 128  ;;  %p685_p0 = scmp.lt.u32.totalorder %s923_s7, %s1078_s0 }
  0x17   : > { %p682_p12 = pnand %p681_p11, %p680_p10  ;;  %p686_p1 = scmp.lt.u32.totalorder %s684_s23, %s679_s13 }
  0x18   : > { %p688_p3 = scmp.lt.u32.totalorder %s679_s13, %s923_s7 }
  0x19   : > { %p683_p13 = pneg %p682_p12  ;;  %p687_p2 = por %p686_p1, %p685_p0 }
  0x1b   : > { %p689_p4 = por %p688_p3, %p687_p2 }
  0x1d   : > { %p690_p5 = pnand %p689_p4, %p683_p13 }
  0x1f   : > { %693 = shalt.err (!%p690_p5)
}
  0x20   : > { %s694_s30 = scalar_lea.vmem %s931_s9, 64  ;;  %s825_s5 = smov [#allocation4]  }
  0x21   : > { %p695_p6 = scmp.ne.s32.totalorder %s931_s9, %s694_s30  ;;  %s699_s6 = sshll.u32 %s825_s5, 4  ;;  %s700_s6 = int_to_ptr.vmem [resolvable:$false] %s699_s6 }
  0x22   : > { %s701_s8 = scalar_lea.vmem %s700_s6, 128  ;;  %p702_p12 = scmp.lt.s32.totalorder %s931_s9, %s700_s6 }
  0x23   : > { %p697_p8 = pnand %p695_p6, %p681_p11  ;;  %p703_p0 = scmp.lt.s32.totalorder %s701_s8, %s694_s30 }
  0x25   : > { %p698_p10 = pneg %p697_p8  ;;  %p704_p1 = por %p703_p0, %p702_p12 }
  0x27   : > { %p705_p2 = pnand %p704_p1, %p698_p10 }
  0x29   : > { %708 = shalt.err (!%p705_p2)
}
  0x2a   : > { %605 = dma.hbm_to_vmem [thread:$0]  (!%p927_p9), %s923_s7, 64, %s931_s9, %s189_s12  }
  0x2b   : > { %s965_s15 = scalar_lea.hbm %s1079_s1, %s544_s29  ;;  %p547_p13 = scmp.ge.s32.totalorder %s823_s20, 1 }
  0x2c   : > { %p226_p3 = scmp.lt.s32.totalorder %s823_s20, 3  ;;  %s212_s23 = scalar_lea.vmem [#allocation7], %s545_s11 }
  0x2d   : > { %s218_s24 = sshll.u32 %s212_s23, 4  ;;  %s209_s7 = scalar_lea.sflag [#allocation8], %s914_s28  ;;  %s975_s24 = int_to_ptr.vmem [resolvable:$true] %s218_s24 }
  0x2e   : > { %p971_p4 = pnand %p547_p13, %p226_p3  ;;  %s709_s9 = scalar_lea.hbm %s965_s15, 1024 }
  0x2f   : > { %p710_p5 = scmp.ne.s32.totalorder %s965_s15, %s709_s9  ;;  %s714_s30 = scalar_lea.hbm %s1079_s1, 2048 }
  0x30   : > { %p715_p10 = scmp.lt.u32.totalorder %s965_s15, %s1079_s1  ;;  %p716_p12 = scmp.lt.u32.totalorder %s714_s30, %s709_s9 }
  0x31   : > { %p712_p6 = pnand %p710_p5, %p681_p11  ;;  %p718_p1 = scmp.lt.u32.totalorder %s709_s9, %s965_s15 }
  0x32   : > { %p717_p0 = por %p716_p12, %p715_p10 }
  0x33   : > { %p713_p8 = pneg %p712_p6 }
  0x34   : > { %p719_p2 = por %p718_p1, %p717_p0 }
  0x36   : > { %p720_p13 = pnand %p719_p2, %p713_p8 }
  0x38   : > { %723 = shalt.err (!%p720_p13)
}
  0x39   : > { %s724_s6 = scalar_lea.vmem %s975_s24, 1024  ;;  %s826_s8 = smov [#allocation7]  }
  0x3a   : > { %p725_p3 = scmp.ne.s32.totalorder %s975_s24, %s724_s6  ;;  %s729_s13 = sshll.u32 %s826_s8, 4  ;;  %s730_s13 = int_to_ptr.vmem [resolvable:$false] %s729_s13 }
  0x3b   : > { %s731_s14 = scalar_lea.vmem %s730_s13, 2048  ;;  %p732_p7 = scmp.lt.s32.totalorder %s975_s24, %s730_s13 }
  0x3c   : > { %p727_p5 = pnand %p725_p3, %p681_p11  ;;  %p733_p10 = scmp.lt.s32.totalorder %s731_s14, %s724_s6 }
  0x3e   : > { %p728_p6 = pneg %p727_p5  ;;  %p734_p12 = por %p733_p10, %p732_p7 }
  0x40   : > { %p735_p0 = pnand %p734_p12, %p728_p6 }
  0x42   : > { %738 = shalt.err (!%p735_p0)
}
  0x43   : > { %s827_s23 = smov 128   ;;  %s828_s9 = smov 64  }
  0x44   : > { %s829_s29 = smov 4   ;;  %230 = sbr.rel (%p971_p4) target bundleno = 422 (0x1a6), region = 36 }
  0x45   : > { %608 = dma.hbm_to_vmem [thread:$0]  (!%p927_p9), %s965_s15, 1024, %s975_s24, %s209_s7, %s827_s23, %s828_s9, %s829_s29  }
  0x46   : > { %s232_s12 = sand.u32 (!%p971_p4), 1, %s807_s16   ;;  %p1088_p7 = scmp.ne.s32.totalorder (!%p971_p4), %s1085_s26, 0 }
  0x47   : > { %s548_s30 = sshll.u32 (!%p971_p4), %s232_s12, 2  ;;  %s233_s5 = scalar_lea.sflag (!%p971_p4), [#allocation5], %s232_s12 }
  0x48   : > { %s236_s11 = scalar_lea.vmem (!%p971_p4), [#allocation4], %s548_s30 }
  0x4b   : > { %790 = dma.done.wait (%p1088_p7), %s233_s5, 64  }
  0x4c   : > { %792 = vsyncadd (%p1088_p7), %s233_s5, 4294967232  ;;  %s549_s6 = sshll.u32 %s232_s12, 6  ;;  %s242_s8 = scalar_lea.sflag [#allocation8], %s232_s12 }
  0x4d   : > { %s1010_s10 = scalar_lea.vmem [#allocation7], %s549_s6 }
  0x4e   : > { %794 = dma.done.wait (%p1088_p7), %s242_s8, 1024  }
  0x4f   : > { %796 = vsyncadd (%p1088_p7), %s242_s8, 4294966272  ;;  %p550_p9 = scmp.ne.s32.totalorder %s815_s18, 0 }
  0x50   : > { %vm284_vm0 = vcmask (!%p550_p9), 7168   ;;  %v830_v0 = vmov (!%p550_p9), 0.0  }
  0x51   : > { %282 = sbr.rel (%p550_p9) target bundleno = 88 (0x58), region = 48  ;;  %283 = vst [vmem:[#allocation2] sm:$0xff] (!%p550_p9), %v830_v0  ;;  %285 = vst.msk [vmem:[#allocation3] sm:$0xff] (!%p550_p9), %vm284_vm0, %v830_v0 }
  0x58 PF: > { %v668_v1 = vld [vmem:[%s1010_s10] sm:$0xff]   ;;  %v831_v2 = vmov 0.0   ;;  %vm832_vm1 = vmmov 0   ;;  %v669_v3 = vld [vmem:[%s1010_s10 + $0x8] sm:$0xff]   ;;  %v286_v4 = vld [vmem:[%s236_s11] sm:$0xf] }
  0x59   : > { %574 = vmatprep.subr.bf16.mxu0 %v831_v2  ;;  %590 = vmatprep.mubr.msk.bf16.mxu0 %vm832_vm1, %v831_v2  ;;  %v287_v5 = vunpack.c.l.bf16 %v286_v4  ;;  %v670_v7 = vld [vmem:[%s1010_s10 + $0x10] sm:$0xff]   ;;  %v671_v8 = vld [vmem:[%s1010_s10 + $0x18] sm:$0xff]   ;;  %v672_v9 = vld [vmem:[%s1010_s10 + $0x20] sm:$0xff]   ;;  %vm293_vm2 = vcmask 7168   ;;  %p559_p11 = scmp.ne.s32.totalorder %s815_s18, 1 }
  0x5a   : > { %575 = vmatpush3.bf16.xpose.msra.mxu0 %v668_v1  ;;  %v673_v10 = vld [vmem:[%s1010_s10 + $0x28] sm:$0xff]   ;;  %v674_v11 = vld [vmem:[%s1010_s10 + $0x30] sm:$0xff]   ;;  %v675_v12 = vld [vmem:[%s1010_s10 + $0x38] sm:$0xff]   ;;  %v833_v23 = vmov (!%p559_p11), 0  }
  0x5b   : > { %576 = vmatprep.subr.bf16.mxu0 %v831_v2  ;;  %v289_v6 = vmul.f32 %v287_v5, %v287_v5  ;;  %v288_v13 = vld [vmem:[#allocation3] sm:$0xff]  ;;  %v295_v16 = vld [vmem:[#allocation2] sm:$0xff]  ;;  %676 = vset.pattern.permute.xlu0 (!%p559_p11), %v833_v23 }
  0x5c   : > { %v560_v27 = vld [vmem:[%s1080_s2] ss:$0 sm:$0xff] (!%p559_p11) }
  0x5d   : > { %290 = vadd.xlane.f32.xlu0 %v289_v6  ;;  %v424_v30 = vld [vmem:[%s1081_s3] sm:$0xff] (!%p559_p11) }
  0x62   : > { %577 = vmatpush3.bf16.xpose.msra.mxu0 %v669_v3 }
  0x63   : > { %578 = vmatprep.subr.bf16.mxu0 %v831_v2 }
  0x6a   : > { %579 = vmatpush3.bf16.xpose.msra.mxu0 %v670_v7 }
  0x6b   : > { %580 = vmatprep.subr.bf16.mxu0 %v831_v2 }
  0x72   : > { %581 = vmatpush3.bf16.xpose.msra.mxu0 %v671_v8 }
  0x73   : > { %582 = vmatprep.subr.bf16.mxu0 %v831_v2 }
  0x7a   : > { %583 = vmatpush3.bf16.xpose.msra.mxu0 %v672_v9 }
  0x7b   : > { %584 = vmatprep.subr.bf16.mxu0 %v831_v2 }
  0x82   : > { %585 = vmatpush3.bf16.xpose.msra.mxu0 %v673_v10 }
  0x83   : > { %586 = vmatprep.subr.bf16.mxu0 %v831_v2 }
  0x8a   : > { %587 = vmatpush3.bf16.xpose.msra.mxu0 %v674_v11 }
  0x8b   : > { %588 = vmatprep.subr.bf16.mxu0 %v831_v2 }
  0x92   : > { %589 = vmatpush3.bf16.xpose.msra.mxu0 %v675_v12 }
  0x99   : > { %591 = vmatmul.mubr.bf16.vlgmr.msra.gmra.mrb[0].mxu0 %v286_v4 }
  0xea   : > { %v291_v14 = vpop.xlane.xlu0 %290 }
  0xeb   : > { %v292_v15 = vadd.f32 %v291_v14, %v288_v13 }
  0xed   : > { %294 = vst.msk [vmem:[#allocation3] sm:$0xff] %vm293_vm2, %v292_v15 }
  0xf4   : > { %v406_v22 = vld [vmem:[#allocation3] sm:$0xff] (!%p559_p11) }
  0xf5   : > { %v407_v24 = vmax.f32 (!%p559_p11), %v406_v22, 1e-24 }
  0xf7   : > { %677 = vrsqrt.f32 (!%p559_p11), %v407_v24 }
 0x101   : > { %v678_v25 = vpop.eup (!%p559_p11), %677 }
 0x102   : > { %412 = vperm.xlu0 (!%p559_p11), %676, %v678_v25  }
 0x169   : > { %405 = sbr.rel (%p559_p11) target bundleno = 397 (0x18d), region = 52 }
 0x16c   : > { %v394_v17 = vpop.f32.mrb[0].mxu0 }
 0x16d   : > { %v400_v18 = vadd.f32 %v394_v17, %v295_v16  ;;  %v592_v19 = vpop.f32.mrb[1].mxu0 }
 0x16e   : > { %v397_v20 = vpop.f32.mrb[2].mxu0 }
 0x16f   : > { %401 = vst [vmem:[#allocation2] sm:$0xff] %v400_v18  ;;  %v593_v21 = vpop.f32.mrb[3].mxu0 }
 0x176   : > { %v409_v26 = vld [vmem:[#allocation2] sm:$0xff] }
 0x181   : > { %v413_v28 = vpop.permute.xlu0 %412 }
 0x182   : > { %v415_v29 = vmul.f32 %v413_v28, %v409_v26 }
 0x184   : > { %v423_v31 = vadd.f32 %v560_v27, %v415_v29 }
 0x186   : > { %v425_v32 = vadd.f32 %v424_v30, %v423_v31 }
 0x188   : > { %v426_v33 = vmax.f32 %v425_v32, 0.0 }
 0x18a   : > { %v427_v34 = vpack.c.bf16 %v426_v33, %v426_v33 }
 0x18c   : > { %428 = vst [vmem:[#allocation9] sm:$0xf] %v427_v34 }
 0x18d PF: > { %p1034_p4 = scmp.eq.s32.totalorder %s539_s21, 1  ;;  %s834_s25 = smov [#allocation9]  }
 0x18e   : > { %s438_s7 = sshll.u32 %s834_s25, 4  ;;  %s439_s7 = int_to_ptr.vmem [resolvable:$true] %s438_s7 }
 0x18f   : > { %s739_s13 = scalar_lea.vmem %s439_s7, 64  ;;  %p746_p13 = scmp.lt.s32.totalorder %s439_s7, %s439_s7 }
 0x190   : > { %p740_p8 = scmp.ne.s32.totalorder %s439_s7, %s739_s13  ;;  %p747_p3 = scmp.lt.s32.totalorder %s739_s13, %s739_s13 }
 0x192   : > { %p741_p1 = pnand %p740_p8, %p1034_p4  ;;  %p748_p5 = por %p747_p3, %p746_p13 }
 0x194   : > { %p742_p2 = pneg %p741_p1 }
 0x196   : > { %p749_p6 = pnand %p748_p5, %p742_p2 }
 0x198   : > { %752 = shalt.err (!%p749_p6)
}
 0x199   : > { %s753_s21 = scalar_lea.hbm %s1082_s4, 64 }
 0x19a   : > { %p754_p10 = scmp.ne.s32.totalorder %s1082_s4, %s753_s21  ;;  %p759_p7 = scmp.lt.u32.totalorder %s753_s21, %s1082_s4 }
 0x19c   : > { %p755_p12 = pnand %p754_p10, %p1034_p4 }
 0x19e   : > { %p756_p0 = pneg %p755_p12 }
 0x1a0   : > { %p761_p9 = pnand %p759_p7, %p756_p0 }
 0x1a2   : > { %764 = shalt.err (!%p761_p9)
}
 0x1a3   : > { %599 = dma.vmem_to_hbm [thread:$0]  (%p1034_p4), %s439_s7, 64, %s1082_s4, [#allocation6]  }
 0x1a4   : > { %798 = dma.done.wait (%p1034_p4), [#allocation6], 64  }
 0x1a5   : > { %800 = vsyncadd (%p1034_p4), [#allocation6], 4294967232 }
 0x1a6 PF: > { %s21_s20 = sadd.s32 1, %s823_s20   ;;  %s1090_s15 = smov %s807_s16 }
 0x1a7   : > { %p18_p11 = scmp.ge.s32.totalorder %s21_s20, 4   ;;  %s1091_s16 = smov %s811_s17 }
 0x1a8   : > { %s1092_s17 = smov %s911_s27  ;;  %s1093_s18 = smov %s819_s19 }
 0x1a9   : > { %s1094_s19 = smov %s1096_s22  ;;  %20 = sbr.rel (!%p18_p11) target bundleno = 7 (0x7), region = 98 }
 0x1b0   :  { %451 = vsyncpa [#allocation5], 1 }
 0x1b1   :  { %453 = vsyncpa [#allocation5 + $0x1], 1 }
 0x1b2   :  { %454 = vsyncpa [#allocation8], 1 }
 0x1b3   :  { %456 = vsyncpa [#allocation8 + $0x1], 1 }
 0x1b4   :  { %457 = vsyncpa [#allocation6], 1 }
 0x1b5   :  { %459 = vsyncpa [#allocation6 + $0x1], 1 }

</bundles_post_ra>
